<compile_context>
chip_gen: v7x
topology: tpu7x:2x2x1
jax: 0.10.0
libtpu: 0.0.40
codegen_flags: <defaults>
</compile_context>

<pallas_src>
import functools

import jax
import jax.numpy as jnp
from jax.experimental import pallas as pl
from jax.experimental.pallas import tpu as pltpu

K_STEPS = 4  # args.K


def _round_up(x, m):
    return ((x + m - 1) // m) * m


# -----------------------------------------------------------------------------
# Kernel 1: MLP  z = relu(x@W1+b1)@W2+b2  plus the pred_0 retain-score term
#            out0 = sigmoid(z . wp + bp) * z.     (Dropout is identity.)
# -----------------------------------------------------------------------------
def mlp_kernel(x_ref, w1_ref, b1_ref, w2_ref, b2_ref, wp_ref, bp_ref,
               z_ref, out_ref):
    h = jnp.dot(x_ref[...], w1_ref[...], preferred_element_type=jnp.float32)
    h = jnp.maximum(h + b1_ref[...], 0.0)
    z = jnp.dot(h, w2_ref[...], preferred_element_type=jnp.float32) + b2_ref[...]
    z_ref[...] = z
    # Retain score on the VPU/XLU (multiply + lane reduce), bp from SMEM.
    t = jnp.sum(z * wp_ref[...], axis=-1, keepdims=True) + bp_ref[0]
    s = 1.0 / (1.0 + jnp.exp(-t))
    out_ref[...] = s * z


# -----------------------------------------------------------------------------
# Kernel 2 (called K times): one propagation step  cur_next = A @ cur,
# tiled over (row tiles, contraction tiles). The retain-score weighted update
#   out_next = out_prev + sigmoid(cur_next . wp + bp) * cur_next
# is fused into the reduction finalize; out_prev is aliased to out_next.
# -----------------------------------------------------------------------------
def prop_step_kernel(a_ref, cur_ref, wp_ref, bp_ref, out_prev_ref,
                     cur_next_ref, out_next_ref):
    kk = pl.program_id(1)

    @pl.when(kk == 0)
    def _():
        cur_next_ref[...] = jnp.zeros_like(cur_next_ref)

    cur_next_ref[...] += jnp.dot(a_ref[...], cur_ref[...],
                                 preferred_element_type=jnp.float32)

    @pl.when(kk == pl.num_programs(1) - 1)
    def _():
        nxt = cur_next_ref[...]
        t = jnp.sum(nxt * wp_ref[...], axis=-1, keepdims=True) + bp_ref[0]
        s = 1.0 / (1.0 + jnp.exp(-t))
        out_next_ref[...] = out_prev_ref[...] + s * nxt


# -----------------------------------------------------------------------------
# Kernel 3: log_softmax over classes, masking the padded class lanes.
# -----------------------------------------------------------------------------
def log_softmax_kernel(x_ref, o_ref, *, num_classes):
    x = x_ref[...]
    col = jax.lax.broadcasted_iota(jnp.int32, x.shape, 1)
    masked = jnp.where(col < num_classes, x, -1e30)
    m = jnp.max(masked, axis=-1, keepdims=True)
    sh = masked - m
    lse = jnp.log(jnp.sum(jnp.exp(sh), axis=-1, keepdims=True))
    o_ref[...] = sh - lse


# -----------------------------------------------------------------------------
# Wrapper
# -----------------------------------------------------------------------------
@functools.partial(jax.jit, static_argnames=("k_steps", "block_rows"))
def dagnn_forward(x, w1, b1, w2, b2, a, wp, bp, *, k_steps=K_STEPS,
                  block_rows=256):
    N, F = x.shape
    H = w1.shape[1]
    C = w2.shape[1]
    f32 = jnp.float32

    C_pad = _round_up(C, 128)           # lane-dense class dim
    F_pad = _round_up(F, 128)
    H_pad = _round_up(H, 128)
    tm = min(block_rows, _round_up(N, 8))
    N_pad = _round_up(N, tm)
    tk = tm
    n_row = N_pad // tm
    n_red = N_pad // tk

    def pad2(arr, r, c):
        return jnp.pad(arr.astype(f32),
                       ((0, r - arr.shape[0]), (0, c - arr.shape[1])))

    x_p = pad2(x, N_pad, F_pad)
    w1_p = pad2(w1, F_pad, H_pad)
    b1_p = pad2(b1, 1, H_pad)
    w2_p = pad2(w2, H_pad, C_pad)
    b2_p = pad2(b2, 1, C_pad)
    wp_row = pad2(wp.T, 1, C_pad)            # proj weight as [1, C_pad] row
    bp_s = bp.reshape(-1).astype(f32)        # scalar -> SMEM
    # TODO(synk): on v6e/v7x store A in bfloat16 to halve the dominant HBM
    # traffic; kept f32 here to preserve the module's f32 numerics exactly.
    a_p = pad2(a, N_pad, N_pad)

    smem_spec = pl.BlockSpec(memory_space=pltpu.MemorySpace.SMEM)

    # ---- MLP + initial retain-score contribution ---------------------------
    z, out_acc = pl.pallas_call(
        mlp_kernel,
        grid=(n_row,),
        in_specs=[
            pl.BlockSpec((tm, F_pad), lambda i: (i, 0)),      # x rows
            pl.BlockSpec((F_pad, H_pad), lambda i: (0, 0)),   # W1 (resident)
            pl.BlockSpec((1, H_pad), lambda i: (0, 0)),       # b1
            pl.BlockSpec((H_pad, C_pad), lambda i: (0, 0)),   # W2
            pl.BlockSpec((1, C_pad), lambda i: (0, 0)),       # b2
            pl.BlockSpec((1, C_pad), lambda i: (0, 0)),       # wp row
            smem_spec,                                        # bp scalar
        ],
        out_specs=(
            pl.BlockSpec((tm, C_pad), lambda i: (i, 0)),      # z
            pl.BlockSpec((tm, C_pad), lambda i: (i, 0)),      # out accumulator
        ),
        out_shape=(
            jax.ShapeDtypeStruct((N_pad, C_pad), f32),
            jax.ShapeDtypeStruct((N_pad, C_pad), f32),
        ),
        compiler_params=pltpu.CompilerParams(dimension_semantics=("parallel",)),
    )(x_p, w1_p, b1_p, w2_p, b2_p, wp_row, bp_s)

    # ---- K propagation steps (sequential passes; each pass fully tiled) ----
    prop_call = pl.pallas_call(
        prop_step_kernel,
        grid=(n_row, n_red),
        in_specs=[
            pl.BlockSpec((tm, tk), lambda i, k: (i, k)),      # A tile
            pl.BlockSpec((tk, C_pad), lambda i, k: (k, 0)),   # cur tile
            pl.BlockSpec((1, C_pad), lambda i, k: (0, 0)),    # wp row
            smem_spec,                                        # bp scalar
            pl.BlockSpec((tm, C_pad), lambda i, k: (i, 0)),   # out_prev
        ],
        out_specs=(
            pl.BlockSpec((tm, C_pad), lambda i, k: (i, 0)),   # cur_next
            pl.BlockSpec((tm, C_pad), lambda i, k: (i, 0)),   # out_next
        ),
        out_shape=(
            jax.ShapeDtypeStruct((N_pad, C_pad), f32),
            jax.ShapeDtypeStruct((N_pad, C_pad), f32),
        ),
        input_output_aliases={4: 1},       # accumulate out in place
        compiler_params=pltpu.CompilerParams(
            dimension_semantics=("parallel", "arbitrary")),
        cost_estimate=pl.CostEstimate(
            flops=2 * N_pad * N_pad * C_pad,
            transcendentals=N_pad,
            bytes_accessed=4 * (N_pad * N_pad + 4 * N_pad * C_pad)),
    )

    cur = z
    for _ in range(k_steps):               # K is static
        cur, out_acc = prop_call(a_p, cur, wp_row, bp_s, out_acc)

    # ---- masked log_softmax over classes ------------------------------------
    out = pl.pallas_call(
        functools.partial(log_softmax_kernel, num_classes=C),
        grid=(n_row,),
        in_specs=[pl.BlockSpec((tm, C_pad), lambda i: (i, 0))],
        out_specs=pl.BlockSpec((tm, C_pad), lambda i: (i, 0)),
        out_shape=jax.ShapeDtypeStruct((N_pad, C_pad), f32),
        compiler_params=pltpu.CompilerParams(dimension_semantics=("parallel",)),
    )(out_acc)

    return out[:N, :C]


# -----------------------------------------------------------------------------
# Pure-JAX reference (matches the PyTorch module in eval mode)
# -----------------------------------------------------------------------------
def reference_forward(x, w1, b1, w2, b2, a, wp, bp, k_steps=K_STEPS):
    h = jnp.maximum(x @ w1 + b1, 0.0)
    z = h @ w2 + b2
    preds = [z]
    cur = z
    for _ in range(k_steps):
        cur = a @ cur
        preds.append(cur)
    pps = jnp.stack(preds, axis=1)                           # [N, K+1, C]
    rs = jax.nn.sigmoid((pps @ wp).squeeze(-1) + bp[0, 0])   # [N, K+1]
    out = jnp.einsum("nk,nkc->nc", rs, pps)
    return jax.nn.log_softmax(out, axis=1)


def make_inputs(key, N, F, H, C, E):
    kx, kw1, kb1, kw2, kb2, kwp, kbp, ksrc, kdst = jax.random.split(key, 9)
    x = jax.random.normal(kx, (N, F), jnp.float32)
    w1 = jax.random.normal(kw1, (F, H), jnp.float32) / jnp.sqrt(F)
    b1 = 0.01 * jax.random.normal(kb1, (1, H), jnp.float32)
    w2 = jax.random.normal(kw2, (H, C), jnp.float32) / jnp.sqrt(H)
    b2 = 0.01 * jax.random.normal(kb2, (1, C), jnp.float32)
    wp = jax.random.normal(kwp, (C, 1), jnp.float32) / jnp.sqrt(C)
    bp = 0.01 * jax.random.normal(kbp, (1, 1), jnp.float32)
    # Synthetic graph: random edges + self loops, GCN symmetric normalization.
    src = jax.random.randint(ksrc, (E,), 0, N)
    dst = jax.random.randint(kdst, (E,), 0, N)
    src = jnp.concatenate([src, jnp.arange(N)])
    dst = jnp.concatenate([dst, jnp.arange(N)])
    deg = jnp.zeros((N,), jnp.float32).at[dst].add(1.0)
    norm = 1.0 / jnp.sqrt(jnp.maximum(deg[src] * deg[dst], 1e-12))
    a = jnp.zeros((N, N), jnp.float32).at[dst, src].add(norm)
    return x, w1, b1, w2, b2, a, wp, bp


if __name__ == "__main__":
    key = jax.random.PRNGKey(0)
    k1, k2 = jax.random.split(key)

    # Small DAGNN-consistent shapes (single-tile path).
    args1 = make_inputs(k1, N=16, F=32, H=32, C=8, E=40)
    out1 = dagnn_forward(*args1)
    jax.block_until_ready(out1)
    ref1 = reference_forward(*args1)
    assert out1.shape == (16, 8)
    assert jnp.allclose(out1, ref1, atol=1e-4, rtol=1e-4), "small-case mismatch"

    # Larger case exercising the multi-tile grid, padding and in-place accum.
    args2 = make_inputs(k2, N=384, F=48, H=64, C=7, E=1500)
    out2 = dagnn_forward(*args2)
    jax.block_until_ready(out2)
    ref2 = reference_forward(*args2)
    assert out2.shape == (384, 7)
    assert jnp.allclose(out2, ref2, atol=1e-3, rtol=1e-3), "tiled-case mismatch"

    print("KERNEL_OK")
</pallas_src>

<mosaic_0001>
module attributes {stable_mosaic.version = 11 : i64} {
  func.func @prop_step_kernel(%arg0: i32, %arg1: i32, %arg2: memref<16x16xf32, #tpu.memory_space<vmem>>, %arg3: memref<16x128xf32, #tpu.memory_space<vmem>>, %arg4: memref<1x128xf32, #tpu.memory_space<vmem>>, %arg5: memref<1xf32, #tpu.memory_space<smem>>, %arg6: memref<16x128xf32, #tpu.memory_space<vmem>>, %arg7: memref<16x128xf32, #tpu.memory_space<vmem>>, %arg8: memref<16x128xf32, #tpu.memory_space<vmem>>) attributes {dimension_semantics = [#tpu.dimension_semantics<parallel>, #tpu.dimension_semantics<arbitrary>], iteration_bounds = array<i64: 1, 1>, scalar_prefetch = 0 : i64, scratch_operands = 0 : i64, tpu.core_type = #tpu.core_type<tc>, window_params = [{transform_indices = @transform_0, window_bounds = array<i64: 16, 16>}, {transform_indices = @transform_1, window_bounds = array<i64: 16, 128>}, {pipeline_mode = #tpu.pipeline_mode<synchronous>, transform_indices = @transform_2, window_bounds = array<i64: 1, 128>}, {transform_indices = @transform_3, window_bounds = array<i64: 1>}, {transform_indices = @transform_4, window_bounds = array<i64: 16, 128>}, {transform_indices = @transform_5, window_bounds = array<i64: 16, 128>}, {transform_indices = @transform_6, window_bounds = array<i64: 16, 128>}]} {
    %c0_i32 = arith.constant 0 : i32
    %0 = arith.cmpi eq, %arg1, %c0_i32 : i32
    %1 = arith.extui %0 : i1 to i32
    %c0_i32_0 = arith.constant 0 : i32
    %2 = arith.cmpi ne, %1, %c0_i32_0 : i32
    scf.if %2 {
      %cst_10 = arith.constant 0.000000e+00 : f32
      %12 = vector.broadcast %cst_10 : f32 to vector<16x128xf32>
      %c0_11 = arith.constant 0 : index
      %c0_12 = arith.constant 0 : index
      %13 = vector.load %arg7[%c0_11, %c0_12] : memref<16x128xf32, #tpu.memory_space<vmem>>, vector<16x128xf32>
      tpu.vector_store %arg7[%c0_11, %c0_12], %12 {strides = array<i32>} : memref<16x128xf32, #tpu.memory_space<vmem>>, vector<16x128xf32>,
    } else {
    }
    %c0 = arith.constant 0 : index
    %c0_1 = arith.constant 0 : index
    %3 = vector.load %arg7[%c0, %c0_1] : memref<16x128xf32, #tpu.memory_space<vmem>>, vector<16x128xf32>
    %c0_2 = arith.constant 0 : index
    %c0_3 = arith.constant 0 : index
    %4 = vector.load %arg2[%c0_2, %c0_3] : memref<16x16xf32, #tpu.memory_space<vmem>>, vector<16x16xf32>
    %c0_4 = arith.constant 0 : index
    %c0_5 = arith.constant 0 : index
    %5 = vector.load %arg3[%c0_4, %c0_5] : memref<16x128xf32, #tpu.memory_space<vmem>>, vector<16x128xf32>
    %cst = arith.constant dense<0.000000e+00> : vector<16x128xf32>
    %6 = tpu.matmul %4, %5, %cst {dimension_numbers = #tpu.dot_dimension_numbers<[1], [0], [0], [1], [0, 0, 1, 1], [], []>} : vector<16x16xf32>, vector<16x128xf32>, vector<16x128xf32> -> vector<16x128xf32>
    %7 = arith.addf %3, %6 : vector<16x128xf32>
    %c0_6 = arith.constant 0 : index
    %c0_7 = arith.constant 0 : index
    %8 = vector.load %arg7[%c0_6, %c0_7] : memref<16x128xf32, #tpu.memory_space<vmem>>, vector<16x128xf32>
    tpu.vector_store %arg7[%c0_6, %c0_7], %7 {strides = array<i32>} : memref<16x128xf32, #tpu.memory_space<vmem>>, vector<16x128xf32>,
    %c0_i32_8 = arith.constant 0 : i32
    %9 = arith.cmpi eq, %arg1, %c0_i32_8 : i32
    %10 = arith.extui %9 : i1 to i32
    %c0_i32_9 = arith.constant 0 : i32
    %11 = arith.cmpi ne, %10, %c0_i32_9 : i32
    scf.if %11 {
      %c0_10 = arith.constant 0 : index
      %c0_11 = arith.constant 0 : index
      %12 = vector.load %arg7[%c0_10, %c0_11] : memref<16x128xf32, #tpu.memory_space<vmem>>, vector<16x128xf32>
      %c0_12 = arith.constant 0 : index
      %c0_13 = arith.constant 0 : index
      %13 = vector.load %arg4[%c0_12, %c0_13] : memref<1x128xf32, #tpu.memory_space<vmem>>, vector<1x128xf32>
      %14 = vector.broadcast %13 : vector<1x128xf32> to vector<16x128xf32>
      %15 = arith.mulf %12, %14 : vector<16x128xf32>
      %cst_14 = arith.constant dense<0.000000e+00> : vector<16xf32>
      %16 = vector.multi_reduction <add>, %15, %cst_14 [1] : vector<16x128xf32> to vector<16xf32>
      %17 = vector.shape_cast %16 : vector<16xf32> to vector<16x1xf32>
      %c0_15 = arith.constant 0 : index
      %18 = memref.load %arg5[%c0_15] : memref<1xf32, #tpu.memory_space<smem>>
      %19 = vector.broadcast %18 : f32 to vector<16x1xf32>
      %20 = arith.addf %17, %19 : vector<16x1xf32>
      %cst_16 = arith.constant 0.000000e+00 : f32
      %21 = vector.broadcast %cst_16 : f32 to vector<16x1xf32>
      %22 = arith.subf %21, %20 : vector<16x1xf32>
      %23 = math.exp %22 : vector<16x1xf32>
      %cst_17 = arith.constant 1.000000e+00 : f32
      %24 = vector.broadcast %cst_17 : f32 to vector<16x1xf32>
      %25 = arith.addf %24, %23 : vector<16x1xf32>
      %cst_18 = arith.constant 1.000000e+00 : f32
      %26 = vector.broadcast %cst_18 : f32 to vector<16x1xf32>
      %27 = arith.divf %26, %25 : vector<16x1xf32>
      %c0_19 = arith.constant 0 : index
      %c0_20 = arith.constant 0 : index
      %28 = vector.load %arg6[%c0_19, %c0_20] : memref<16x128xf32, #tpu.memory_space<vmem>>, vector<16x128xf32>
      %29 = vector.broadcast %27 : vector<16x1xf32> to vector<16x128xf32>
      %30 = arith.mulf %29, %12 : vector<16x128xf32>
      %31 = arith.addf %28, %30 : vector<16x128xf32>
      %c0_21 = arith.constant 0 : index
      %c0_22 = arith.constant 0 : index
      %32 = vector.load %arg8[%c0_21, %c0_22] : memref<16x128xf32, #tpu.memory_space<vmem>>, vector<16x128xf32>
      tpu.vector_store %arg8[%c0_21, %c0_22], %31 {strides = array<i32>} : memref<16x128xf32, #tpu.memory_space<vmem>>, vector<16x128xf32>,
    } else {
    }
    return
  }
  func.func @transform_0(%arg0: i32, %arg1: i32) -> (i32, i32) {
    %c0_i32 = arith.constant 0 : i32
    return %arg0, %arg1 : i32, i32
  }
  func.func @transform_1(%arg0: i32, %arg1: i32) -> (i32, i32) {
    %c0_i32 = arith.constant 0 : i32
    %c0_i32_0 = arith.constant 0 : i32
    return %arg1, %c0_i32 : i32, i32
  }
  func.func @transform_2(%arg0: i32, %arg1: i32) -> (i32, i32) {
    %c0_i32 = arith.constant 0 : i32
    %c0_i32_0 = arith.constant 0 : i32
    %c0_i32_1 = arith.constant 0 : i32
    return %c0_i32, %c0_i32_0 : i32, i32
  }
  func.func @transform_3(%arg0: i32, %arg1: i32) -> i32 {
    %c0_i32 = arith.constant 0 : i32
    %c0_i32_0 = arith.constant 0 : i32
    return %c0_i32 : i32
  }
  func.func @transform_4(%arg0: i32, %arg1: i32) -> (i32, i32) {
    %c0_i32 = arith.constant 0 : i32
    %c0_i32_0 = arith.constant 0 : i32
    return %arg0, %c0_i32 : i32, i32
  }
  func.func @transform_5(%arg0: i32, %arg1: i32) -> (i32, i32) {
    %c0_i32 = arith.constant 0 : i32
    %c0_i32_0 = arith.constant 0 : i32
    return %arg0, %c0_i32 : i32, i32
  }
  func.func @transform_6(%arg0: i32, %arg1: i32) -> (i32, i32) {
    %c0_i32 = arith.constant 0 : i32
    %c0_i32_0 = arith.constant 0 : i32
    return %arg0, %c0_i32 : i32, i32
  }
}

module attributes {stable_mosaic.version = 11 : i64} {
  func.func @log_softmax_kernel(%arg0: i32, %arg1: memref<16x128xf32, #tpu.memory_space<vmem>>, %arg2: memref<16x128xf32, #tpu.memory_space<vmem>>) attributes {dimension_semantics = [#tpu.dimension_semantics<parallel>], iteration_bounds = array<i64: 1>, scalar_prefetch = 0 : i64, scratch_operands = 0 : i64, tpu.core_type = #tpu.core_type<tc>, window_params = [{transform_indices = @transform_0, window_bounds = array<i64: 16, 128>}, {transform_indices = @transform_1, window_bounds = array<i64: 16, 128>}]} {
    %c0 = arith.constant 0 : index
    %c0_0 = arith.constant 0 : index
    %0 = vector.load %arg1[%c0, %c0_0] : memref<16x128xf32, #tpu.memory_space<vmem>>, vector<16x128xf32>
    %1 = tpu.iota {dimensions = array<i32: 1>} : vector<16x128xi32>
    %c8_i32 = arith.constant 8 : i32
    %2 = vector.broadcast %c8_i32 : i32 to vector<16x128xi32>
    %3 = arith.cmpi slt, %1, %2 : vector<16x128xi32>
    %cst = arith.constant -1.000000e+30 : f32
    %4 = vector.broadcast %cst : f32 to vector<16x128xf32>
    %5 = arith.select %3, %0, %4 : vector<16x128xi1>, vector<16x128xf32>
    %cst_1 = arith.constant dense<0xFF800000> : vector<16xf32>
    %6 = vector.multi_reduction <maximumf>, %5, %cst_1 [1] : vector<16x128xf32> to vector<16xf32>
    %7 = vector.shape_cast %6 : vector<16xf32> to vector<16x1xf32>
    %8 = vector.broadcast %7 : vector<16x1xf32> to vector<16x128xf32>
    %9 = arith.subf %5, %8 : vector<16x128xf32>
    %10 = math.exp %9 : vector<16x128xf32>
    %cst_2 = arith.constant dense<0.000000e+00> : vector<16xf32>
    %11 = vector.multi_reduction <add>, %10, %cst_2 [1] : vector<16x128xf32> to vector<16xf32>
    %12 = vector.shape_cast %11 : vector<16xf32> to vector<16x1xf32>
    %13 = math.log %12 : vector<16x1xf32>
    %14 = vector.broadcast %13 : vector<16x1xf32> to vector<16x128xf32>
    %15 = arith.subf %9, %14 : vector<16x128xf32>
    %c0_3 = arith.constant 0 : index
    %c0_4 = arith.constant 0 : index
    %16 = vector.load %arg2[%c0_3, %c0_4] : memref<16x128xf32, #tpu.memory_space<vmem>>, vector<16x128xf32>
    tpu.vector_store %arg2[%c0_3, %c0_4], %15 {strides = array<i32>} : memref<16x128xf32, #tpu.memory_space<vmem>>, vector<16x128xf32>,
    return
  }
  func.func @transform_0(%arg0: i32) -> (i32, i32) {
    %c0_i32 = arith.constant 0 : i32
    %c0_i32_0 = arith.constant 0 : i32
    return %arg0, %c0_i32 : i32, i32
  }
  func.func @transform_1(%arg0: i32) -> (i32, i32) {
    %c0_i32 = arith.constant 0 : i32
    %c0_i32_0 = arith.constant 0 : i32
    return %arg0, %c0_i32 : i32, i32
  }
}

module attributes {stable_mosaic.version = 11 : i64} {
  func.func @mlp_kernel(%arg0: i32, %arg1: memref<16x128xf32, #tpu.memory_space<vmem>>, %arg2: memref<128x128xf32, #tpu.memory_space<vmem>>, %arg3: memref<1x128xf32, #tpu.memory_space<vmem>>, %arg4: memref<128x128xf32, #tpu.memory_space<vmem>>, %arg5: memref<1x128xf32, #tpu.memory_space<vmem>>, %arg6: memref<1x128xf32, #tpu.memory_space<vmem>>, %arg7: memref<1xf32, #tpu.memory_space<smem>>, %arg8: memref<16x128xf32, #tpu.memory_space<vmem>>, %arg9: memref<16x128xf32, #tpu.memory_space<vmem>>) attributes {dimension_semantics = [#tpu.dimension_semantics<parallel>], iteration_bounds = array<i64: 1>, scalar_prefetch = 0 : i64, scratch_operands = 0 : i64, tpu.core_type = #tpu.core_type<tc>, window_params = [{transform_indices = @transform_0, window_bounds = array<i64: 16, 128>}, {pipeline_mode = #tpu.pipeline_mode<synchronous>, transform_indices = @transform_1, window_bounds = array<i64: 128, 128>}, {pipeline_mode = #tpu.pipeline_mode<synchronous>, transform_indices = @transform_2, window_bounds = array<i64: 1, 128>}, {pipeline_mode = #tpu.pipeline_mode<synchronous>, transform_indices = @transform_3, window_bounds = array<i64: 128, 128>}, {pipeline_mode = #tpu.pipeline_mode<synchronous>, transform_indices = @transform_4, window_bounds = array<i64: 1, 128>}, {pipeline_mode = #tpu.pipeline_mode<synchronous>, transform_indices = @transform_5, window_bounds = array<i64: 1, 128>}, {transform_indices = @transform_6, window_bounds = array<i64: 1>}, {transform_indices = @transform_7, window_bounds = array<i64: 16, 128>}, {transform_indices = @transform_8, window_bounds = array<i64: 16, 128>}]} {
    %c0 = arith.constant 0 : index
    %c0_0 = arith.constant 0 : index
    %0 = vector.load %arg1[%c0, %c0_0] : memref<16x128xf32, #tpu.memory_space<vmem>>, vector<16x128xf32>
    %c0_1 = arith.constant 0 : index
    %c0_2 = arith.constant 0 : index
    %1 = vector.load %arg2[%c0_1, %c0_2] : memref<128x128xf32, #tpu.memory_space<vmem>>, vector<128x128xf32>
    %cst = arith.constant dense<0.000000e+00> : vector<16x128xf32>
    %2 = tpu.matmul %0, %1, %cst {dimension_numbers = #tpu.dot_dimension_numbers<[1], [0], [0], [1], [0, 0, 1, 1], [], []>} : vector<16x128xf32>, vector<128x128xf32>, vector<16x128xf32> -> vector<16x128xf32>
    %c0_3 = arith.constant 0 : index
    %c0_4 = arith.constant 0 : index
    %3 = vector.load %arg3[%c0_3, %c0_4] : memref<1x128xf32, #tpu.memory_space<vmem>>, vector<1x128xf32>
    %4 = vector.broadcast %3 : vector<1x128xf32> to vector<16x128xf32>
    %5 = arith.addf %2, %4 : vector<16x128xf32>
    %cst_5 = arith.constant 0.000000e+00 : f32
    %6 = vector.broadcast %cst_5 : f32 to vector<16x128xf32>
    %7 = arith.maximumf %5, %6 : vector<16x128xf32>
    %c0_6 = arith.constant 0 : index
    %c0_7 = arith.constant 0 : index
    %8 = vector.load %arg4[%c0_6, %c0_7] : memref<128x128xf32, #tpu.memory_space<vmem>>, vector<128x128xf32>
    %cst_8 = arith.constant dense<0.000000e+00> : vector<16x128xf32>
    %9 = tpu.matmul %7, %8, %cst_8 {dimension_numbers = #tpu.dot_dimension_numbers<[1], [0], [0], [1], [0, 0, 1, 1], [], []>} : vector<16x128xf32>, vector<128x128xf32>, vector<16x128xf32> -> vector<16x128xf32>
    %c0_9 = arith.constant 0 : index
    %c0_10 = arith.constant 0 : index
    %10 = vector.load %arg5[%c0_9, %c0_10] : memref<1x128xf32, #tpu.memory_space<vmem>>, vector<1x128xf32>
    %11 = vector.broadcast %10 : vector<1x128xf32> to vector<16x128xf32>
    %12 = arith.addf %9, %11 : vector<16x128xf32>
    %c0_11 = arith.constant 0 : index
    %c0_12 = arith.constant 0 : index
    %13 = vector.load %arg8[%c0_11, %c0_12] : memref<16x128xf32, #tpu.memory_space<vmem>>, vector<16x128xf32>
    tpu.vector_store %arg8[%c0_11, %c0_12], %12 {strides = array<i32>} : memref<16x128xf32, #tpu.memory_space<vmem>>, vector<16x128xf32>,
    %c0_13 = arith.constant 0 : index
    %c0_14 = arith.constant 0 : index
    %14 = vector.load %arg6[%c0_13, %c0_14] : memref<1x128xf32, #tpu.memory_space<vmem>>, vector<1x128xf32>
    %15 = vector.broadcast %14 : vector<1x128xf32> to vector<16x128xf32>
    %16 = arith.mulf %12, %15 : vector<16x128xf32>
    %cst_15 = arith.constant dense<0.000000e+00> : vector<16xf32>
    %17 = vector.multi_reduction <add>, %16, %cst_15 [1] : vector<16x128xf32> to vector<16xf32>
    %18 = vector.shape_cast %17 : vector<16xf32> to vector<16x1xf32>
    %c0_16 = arith.constant 0 : index
    %19 = memref.load %arg7[%c0_16] : memref<1xf32, #tpu.memory_space<smem>>
    %20 = vector.broadcast %19 : f32 to vector<16x1xf32>
    %21 = arith.addf %18, %20 : vector<16x1xf32>
    %cst_17 = arith.constant 0.000000e+00 : f32
    %22 = vector.broadcast %cst_17 : f32 to vector<16x1xf32>
    %23 = arith.subf %22, %21 : vector<16x1xf32>
    %24 = math.exp %23 : vector<16x1xf32>
    %cst_18 = arith.constant 1.000000e+00 : f32
    %25 = vector.broadcast %cst_18 : f32 to vector<16x1xf32>
    %26 = arith.addf %25, %24 : vector<16x1xf32>
    %cst_19 = arith.constant 1.000000e+00 : f32
    %27 = vector.broadcast %cst_19 : f32 to vector<16x1xf32>
    %28 = arith.divf %27, %26 : vector<16x1xf32>
    %29 = vector.broadcast %28 : vector<16x1xf32> to vector<16x128xf32>
    %30 = arith.mulf %29, %12 : vector<16x128xf32>
    %c0_20 = arith.constant 0 : index
    %c0_21 = arith.constant 0 : index
    %31 = vector.load %arg9[%c0_20, %c0_21] : memref<16x128xf32, #tpu.memory_space<vmem>>, vector<16x128xf32>
    tpu.vector_store %arg9[%c0_20, %c0_21], %30 {strides = array<i32>} : memref<16x128xf32, #tpu.memory_space<vmem>>, vector<16x128xf32>,
    return
  }
  func.func @transform_0(%arg0: i32) -> (i32, i32) {
    %c0_i32 = arith.constant 0 : i32
    %c0_i32_0 = arith.constant 0 : i32
    return %arg0, %c0_i32 : i32, i32
  }
  func.func @transform_1(%arg0: i32) -> (i32, i32) {
    %c0_i32 = arith.constant 0 : i32
    %c0_i32_0 = arith.constant 0 : i32
    %c0_i32_1 = arith.constant 0 : i32
    return %c0_i32, %c0_i32_0 : i32, i32
  }
  func.func @transform_2(%arg0: i32) -> (i32, i32) {
    %c0_i32 = arith.constant 0 : i32
    %c0_i32_0 = arith.constant 0 : i32
    %c0_i32_1 = arith.constant 0 : i32
    return %c0_i32, %c0_i32_0 : i32, i32
  }
  func.func @transform_3(%arg0: i32) -> (i32, i32) {
    %c0_i32 = arith.constant 0 : i32
    %c0_i32_0 = arith.constant 0 : i32
    %c0_i32_1 = arith.constant 0 : i32
    return %c0_i32, %c0_i32_0 : i32, i32
  }
  func.func @transform_4(%arg0: i32) -> (i32, i32) {
    %c0_i32 = arith.constant 0 : i32
    %c0_i32_0 = arith.constant 0 : i32
    %c0_i32_1 = arith.constant 0 : i32
    return %c0_i32, %c0_i32_0 : i32, i32
  }
  func.func @transform_5(%arg0: i32) -> (i32, i32) {
    %c0_i32 = arith.constant 0 : i32
    %c0_i32_0 = arith.constant 0 : i32
    %c0_i32_1 = arith.constant 0 : i32
    return %c0_i32, %c0_i32_0 : i32, i32
  }
  func.func @transform_6(%arg0: i32) -> i32 {
    %c0_i32 = arith.constant 0 : i32
    %c0_i32_0 = arith.constant 0 : i32
    return %c0_i32 : i32
  }
  func.func @transform_7(%arg0: i32) -> (i32, i32) {
    %c0_i32 = arith.constant 0 : i32
    %c0_i32_0 = arith.constant 0 : i32
    return %arg0, %c0_i32 : i32, i32
  }
  func.func @transform_8(%arg0: i32) -> (i32, i32) {
    %c0_i32 = arith.constant 0 : i32
    %c0_i32_0 = arith.constant 0 : i32
    return %arg0, %c0_i32 : i32, i32
  }
}

module attributes {stable_mosaic.version = 11 : i64} {
  func.func @prop_step_kernel(%arg0: i32, %arg1: i32, %arg2: memref<16x16xf32, #tpu.memory_space<vmem>>, %arg3: memref<16x128xf32, #tpu.memory_space<vmem>>, %arg4: memref<1x128xf32, #tpu.memory_space<vmem>>, %arg5: memref<1xf32, #tpu.memory_space<smem>>, %arg6: memref<16x128xf32, #tpu.memory_space<vmem>>, %arg7: memref<16x128xf32, #tpu.memory_space<vmem>>, %arg8: memref<16x128xf32, #tpu.memory_space<vmem>>) attributes {dimension_semantics = [#tpu.dimension_semantics<parallel>, #tpu.dimension_semantics<arbitrary>], iteration_bounds = array<i64: 1, 1>, scalar_prefetch = 0 : i64, scratch_operands = 0 : i64, tpu.core_type = #tpu.core_type<tc>, window_params = [{transform_indices = @transform_0, window_bounds = array<i64: 16, 16>}, {transform_indices = @transform_1, window_bounds = array<i64: 16, 128>}, {pipeline_mode = #tpu.pipeline_mode<synchronous>, transform_indices = @transform_2, window_bounds = array<i64: 1, 128>}, {transform_indices = @transform_3, window_bounds = array<i64: 1>}, {transform_indices = @transform_4, window_bounds = array<i64: 16, 128>}, {transform_indices = @transform_5, window_bounds = array<i64: 16, 128>}, {transform_indices = @transform_6, window_bounds = array<i64: 16, 128>}]} {
    %c0_i32 = arith.constant 0 : i32
    %0 = arith.cmpi eq, %arg1, %c0_i32 : i32
    %1 = arith.extui %0 : i1 to i32
    %c0_i32_0 = arith.constant 0 : i32
    %2 = arith.cmpi ne, %1, %c0_i32_0 : i32
    scf.if %2 {
      %cst_10 = arith.constant 0.000000e+00 : f32
      %12 = vector.broadcast %cst_10 : f32 to vector<16x128xf32>
      %c0_11 = arith.constant 0 : index
      %c0_12 = arith.constant 0 : index
      %13 = vector.load %arg7[%c0_11, %c0_12] : memref<16x128xf32, #tpu.memory_space<vmem>>, vector<16x128xf32>
      tpu.vector_store %arg7[%c0_11, %c0_12], %12 {strides = array<i32>} : memref<16x128xf32, #tpu.memory_space<vmem>>, vector<16x128xf32>,
    } else {
    }
    %c0 = arith.constant 0 : index
    %c0_1 = arith.constant 0 : index
    %3 = vector.load %arg7[%c0, %c0_1] : memref<16x128xf32, #tpu.memory_space<vmem>>, vector<16x128xf32>
    %c0_2 = arith.constant 0 : index
    %c0_3 = arith.constant 0 : index
    %4 = vector.load %arg2[%c0_2, %c0_3] : memref<16x16xf32, #tpu.memory_space<vmem>>, vector<16x16xf32>
    %c0_4 = arith.constant 0 : index
    %c0_5 = arith.constant 0 : index
    %5 = vector.load %arg3[%c0_4, %c0_5] : memref<16x128xf32, #tpu.memory_space<vmem>>, vector<16x128xf32>
    %cst = arith.constant dense<0.000000e+00> : vector<16x128xf32>
    %6 = tpu.matmul %4, %5, %cst {dimension_numbers = #tpu.dot_dimension_numbers<[1], [0], [0], [1], [0, 0, 1, 1], [], []>} : vector<16x16xf32>, vector<16x128xf32>, vector<16x128xf32> -> vector<16x128xf32>
    %7 = arith.addf %3, %6 : vector<16x128xf32>
    %c0_6 = arith.constant 0 : index
    %c0_7 = arith.constant 0 : index
    %8 = vector.load %arg7[%c0_6, %c0_7] : memref<16x128xf32, #tpu.memory_space<vmem>>, vector<16x128xf32>
    tpu.vector_store %arg7[%c0_6, %c0_7], %7 {strides = array<i32>} : memref<16x128xf32, #tpu.memory_space<vmem>>, vector<16x128xf32>,
    %c0_i32_8 = arith.constant 0 : i32
    %9 = arith.cmpi eq, %arg1, %c0_i32_8 : i32
    %10 = arith.extui %9 : i1 to i32
    %c0_i32_9 = arith.constant 0 : i32
    %11 = arith.cmpi ne, %10, %c0_i32_9 : i32
    scf.if %11 {
      %c0_10 = arith.constant 0 : index
      %c0_11 = arith.constant 0 : index
      %12 = vector.load %arg7[%c0_10, %c0_11] : memref<16x128xf32, #tpu.memory_space<vmem>>, vector<16x128xf32>
      %c0_12 = arith.constant 0 : index
      %c0_13 = arith.constant 0 : index
      %13 = vector.load %arg4[%c0_12, %c0_13] : memref<1x128xf32, #tpu.memory_space<vmem>>, vector<1x128xf32>
      %14 = vector.broadcast %13 : vector<1x128xf32> to vector<16x128xf32>
      %15 = arith.mulf %12, %14 : vector<16x128xf32>
      %cst_14 = arith.constant dense<0.000000e+00> : vector<16xf32>
      %16 = vector.multi_reduction <add>, %15, %cst_14 [1] : vector<16x128xf32> to vector<16xf32>
      %17 = vector.shape_cast %16 : vector<16xf32> to vector<16x1xf32>
      %c0_15 = arith.constant 0 : index
      %18 = memref.load %arg5[%c0_15] : memref<1xf32, #tpu.memory_space<smem>>
      %19 = vector.broadcast %18 : f32 to vector<16x1xf32>
      %20 = arith.addf %17, %19 : vector<16x1xf32>
      %cst_16 = arith.constant 0.000000e+00 : f32
      %21 = vector.broadcast %cst_16 : f32 to vector<16x1xf32>
      %22 = arith.subf %21, %20 : vector<16x1xf32>
      %23 = math.exp %22 : vector<16x1xf32>
      %cst_17 = arith.constant 1.000000e+00 : f32
      %24 = vector.broadcast %cst_17 : f32 to vector<16x1xf32>
      %25 = arith.addf %24, %23 : vector<16x1xf32>
      %cst_18 = arith.constant 1.000000e+00 : f32
      %26 = vector.broadcast %cst_18 : f32 to vector<16x1xf32>
      %27 = arith.divf %26, %25 : vector<16x1xf32>
      %c0_19 = arith.constant 0 : index
      %c0_20 = arith.constant 0 : index
      %28 = vector.load %arg6[%c0_19, %c0_20] : memref<16x128xf32, #tpu.memory_space<vmem>>, vector<16x128xf32>
      %29 = vector.broadcast %27 : vector<16x1xf32> to vector<16x128xf32>
      %30 = arith.mulf %29, %12 : vector<16x128xf32>
      %31 = arith.addf %28, %30 : vector<16x128xf32>
      %c0_21 = arith.constant 0 : index
      %c0_22 = arith.constant 0 : index
      %32 = vector.load %arg8[%c0_21, %c0_22] : memref<16x128xf32, #tpu.memory_space<vmem>>, vector<16x128xf32>
      tpu.vector_store %arg8[%c0_21, %c0_22], %31 {strides = array<i32>} : memref<16x128xf32, #tpu.memory_space<vmem>>, vector<16x128xf32>,
    } else {
    }
    return
  }
  func.func @transform_0(%arg0: i32, %arg1: i32) -> (i32, i32) {
    %c0_i32 = arith.constant 0 : i32
    return %arg0, %arg1 : i32, i32
  }
  func.func @transform_1(%arg0: i32, %arg1: i32) -> (i32, i32) {
    %c0_i32 = arith.constant 0 : i32
    %c0_i32_0 = arith.constant 0 : i32
    return %arg1, %c0_i32 : i32, i32
  }
  func.func @transform_2(%arg0: i32, %arg1: i32) -> (i32, i32) {
    %c0_i32 = arith.constant 0 : i32
    %c0_i32_0 = arith.constant 0 : i32
    %c0_i32_1 = arith.constant 0 : i32
    return %c0_i32, %c0_i32_0 : i32, i32
  }
  func.func @transform_3(%arg0: i32, %arg1: i32) -> i32 {
    %c0_i32 = arith.constant 0 : i32
    %c0_i32_0 = arith.constant 0 : i32
    return %c0_i32 : i32
  }
  func.func @transform_4(%arg0: i32, %arg1: i32) -> (i32, i32) {
    %c0_i32 = arith.constant 0 : i32
    %c0_i32_0 = arith.constant 0 : i32
    return %arg0, %c0_i32 : i32, i32
  }
  func.func @transform_5(%arg0: i32, %arg1: i32) -> (i32, i32) {
    %c0_i32 = arith.constant 0 : i32
    %c0_i32_0 = arith.constant 0 : i32
    return %arg0, %c0_i32 : i32, i32
  }
  func.func @transform_6(%arg0: i32, %arg1: i32) -> (i32, i32) {
    %c0_i32 = arith.constant 0 : i32
    %c0_i32_0 = arith.constant 0 : i32
    return %arg0, %c0_i32 : i32, i32
  }
}

</mosaic_0001>

<bundles_post_ra>
// kernel: dagnn_forward.11
= control target key start
LH: loop header
LB: loop body
LE: loop exit
PB: predicated region body
PF: predicated region fallthrough
CT: control target
= control target key end

     0   :  { %v10_v0 = vlaneseq  ;;  %s71_s0 = inlined_call_operand.vmem [shape: f32[16,128], index: 0, kind: input, shape index: {}]   ;;  %s72_s1 = inlined_call_operand.vmem [shape: f32[16,128], index: 1, kind: output, shape index: {}]  }
   0x1   :  { %v8_v1 = vld [vmem:[%s71_s0] sm:$0xff]  ;;  %v9_v3 = vld [vmem:[%s71_s0 + $0x8] sm:$0xff] }
   0x2   :  { %v11_v2 = vand.u32 127, %v10_v0 }
   0x4   :  { %vm12_vm0 = vcmp.lt.s32.totalorder %v11_v2, 8 }
   0x5   :  { %v13_v4 = vsel %vm12_vm0, %v8_v1, -1e+30  ;;  %v14_v5 = vsel %vm12_vm0, %v9_v3, -1e+30 }
   0x6   :  { %15 = vmax.xlane.f32.xlu0 %v13_v4 }
   0xa   :  { %17 = vmax.xlane.f32.xlu0 %v14_v5 }
  0x93   :  { %v16_v6 = vpop.xlane.xlu0 %15 }
  0x94   :  { %v19_v7 = vsub.f32 %v13_v4, %v16_v6 }
  0x96   :  { %v21_v8 = vmul.f32 1.442695, %v19_v7 }
  0x97   :  { %v18_v9 = vpop.xlane.xlu0 %17 }
  0x98   :  { %v20_v10 = vsub.f32 %v14_v5, %v18_v9  ;;  %41 = vpow2.f32 %v21_v8 }
  0x9a   :  { %v23_v11 = vmul.f32 1.442695, %v20_v10 }
  0x9c   :  { %43 = vpow2.f32 %v23_v11 }
  0xa2   :  { %v42_v12 = vpop.eup %41 }
  0xa3   :  { %25 = vadd.xlane.f32.xlu1 %v42_v12 }
  0xa6   :  { %v44_v13 = vpop.eup %43 }
  0xa7   :  { %27 = vadd.xlane.f32.xlu1 %v44_v13 }
 0x130   :  { %v26_v14 = vpop.xlane.xlu1 %25 }
 0x131   :  { %45 = vlog2.f32 %v26_v14 }
 0x134   :  { %v28_v15 = vpop.xlane.xlu1 %27 }
 0x135   :  { %47 = vlog2.f32 %v28_v15 }
 0x13b   :  { %v46_v16 = vpop.eup %45 }
 0x13c   :  { %v30_v17 = vmul.f32 0.6931472, %v46_v16 }
 0x13e   :  { %v33_v18 = vsub.f32 %v19_v7, %v30_v17 }
 0x13f   :  { %v48_v19 = vpop.eup %47 }
 0x140   :  { %35 = vst [vmem:[%s72_s1] sm:$0xff] %v33_v18  ;;  %v32_v20 = vmul.f32 0.6931472, %v48_v19 }
 0x142   :  { %v34_v21 = vsub.f32 %v20_v10, %v32_v20 }
 0x144   :  { %36 = vst [vmem:[%s72_s1 + $0x8] sm:$0xff] %v34_v21 }

// kernel: dagnn_forward.10
= control target key start
LH: loop header
LB: loop body
LE: loop exit
PB: predicated region body
PF: predicated region fallthrough
CT: control target
= control target key end

     0   :  { %vm36_vm0 = vcmask 130048   ;;  %s318_s0 = inlined_call_operand.vmem [shape: f32[16,16], index: 0, kind: input, shape index: {}]   ;;  %s319_s1 = inlined_call_operand.vmem [shape: f32[16,128], index: 1, kind: input, shape index: {}]   ;;  %s320_s2 = inlined_call_operand.vmem [shape: f32[1,128], index: 2, kind: input, shape index: {}]   ;;  %s321_s3 = inlined_call_operand.<no memory space> [shape: f32[1], index: 3, kind: input, shape index: {}]   ;;  %s322_s4 = inlined_call_operand.vmem [shape: f32[16,128], index: 4, kind: input, shape index: {}, may-alias: {4,6}]   ;;  %s323_s5 = inlined_call_operand.hbm [shape: f32[16,128], index: 5, kind: output, shape index: {0}]   ;;  %s324_s6 = inlined_call_operand.vmem [shape: f32[16,128], index: 6, kind: output, shape index: {1}, may-alias: {4,6}]  }
   0x1   :  { %v34_v0 = vld [vmem:[%s319_s1] sm:$0xff]  ;;  %v35_v1 = vld [vmem:[%s319_s1 + $0x8] sm:$0xff] }
   0x2   :  { %v32_v2 = vld [vmem:[%s318_s0] sm:$0xff]  ;;  %v198_v3 = vpack.c.bf16 %v35_v1, %v34_v0 }
   0x3   :  { %195 = vmatprep.mubr.msk.f32.mxu0 %vm36_vm0, %v32_v2 }
   0x4   :  { %13 = vsyncpa [#allocation4], 0  ;;  %199 = vmatprep.subr.bf16.mxu0 %v198_v3  ;;  %v33_v4 = vld [vmem:[%s318_s0 + $0x8] sm:$0xff]  ;;  %v186_v7 = vld [vmem:[%s320_s2] ss:$0 sm:$0xff]  ;;  %s238_s1 = smov [#allocation3]  }
   0x5   :  { %201 = vmatpush3.bf16.msra.mxu0 %v198_v3  ;;  %s169_s7 = sshll.u32 %s238_s1, 4  ;;  %s170_s7 = int_to_ptr.vmem [resolvable:$true] %s169_s7 }
   0x6   :  { %s214_s8 = scalar_lea.vmem %s170_s7, 256  ;;  %p219_p1 = scmp.lt.s32.totalorder %s170_s7, %s170_s7 }
   0x7   :  { %p215_p0 = scmp.ne.s32.totalorder %s170_s7, %s214_s8  ;;  %p220_p2 = scmp.lt.s32.totalorder %s214_s8, %s214_s8 }
   0x8   :  { %196 = vmatmul.mubr.msk.f32.vlgmr.msra.gmra.mrb[0].mxu0 %vm36_vm0, %v33_v4 }
   0x9   :  { %p221_p3 = por %p220_p2, %p219_p1 }
   0xb   :  { %p222_p4 = pnand %p221_p3, %p215_p0 }
  0xdb   :  { %v197_v5 = vpop.f32.mrb[0].mxu0 }
  0xdc   :  { %v109_v6 = vpop.f32.mrb[1].mxu0  ;;  %121 = vst [vmem:[#allocation3 + $0x8] sm:$0xff] %v197_v5  ;;  %v135_v9 = vmul.f32 %v197_v5, %v186_v7 }
  0xdd   :  { %120 = vst [vmem:[#allocation3] sm:$0xff] %v109_v6  ;;  %v134_v8 = vmul.f32 %v186_v7, %v109_v6 }
  0xdf   :  { %136 = vadd.xlane.f32.xlu0 %v134_v8 }
  0xe3   :  { %138 = vadd.xlane.f32.xlu0 %v135_v9 }
  0xe4   :  { %225 = shalt.err (!%p222_p4)
}
  0xe5   :  { %s226_s2 = scalar_lea.hbm %s323_s5, 256 }
  0xe6   :  { %p227_p5 = scmp.ne.s32.totalorder %s323_s5, %s226_s2  ;;  %p230_p6 = scmp.lt.u32.totalorder %s226_s2, %s323_s5 }
  0xe8   :  { %p232_p7 = pnand %p230_p6, %p227_p5 }
  0xea   :  { %235 = shalt.err (!%p232_p7)
}
  0xeb   :  { %s239_s14 = smov 128   ;;  %s240_s15 = smov 8   ;;  %v141_v10 = vstv %s321_s3  ;;  %v156_v24 = vld [vmem:[%s322_s4] sm:$0xff]  ;;  %v157_v28 = vld [vmem:[%s322_s4 + $0x8] sm:$0xff] }
  0xec   :  { %175 = dma.vmem_to_hbm [thread:$0]  %s170_s7, 256, %s323_s5, [#allocation4], %s239_s14, %s239_s14, %s240_s15  }
 0x16c   :  { %v137_v11 = vpop.xlane.xlu0 %136 }
 0x16d   :  { %v142_v12 = vadd.f32 %v141_v10, %v137_v11 }
 0x16f   :  { %v144_v13 = vsub.f32 0.0, %v142_v12 }
 0x170   :  { %v139_v14 = vpop.xlane.xlu0 %138 }
 0x171   :  { %v146_v15 = vmul.f32 1.442695, %v144_v13  ;;  %v143_v16 = vadd.f32 %v141_v10, %v139_v14 }
 0x173   :  { %206 = vpow2.f32 %v146_v15  ;;  %v145_v17 = vsub.f32 0.0, %v143_v16 }
 0x175   :  { %v148_v18 = vmul.f32 1.442695, %v145_v17 }
 0x177   :  { %208 = vpow2.f32 %v148_v18 }
 0x17d   :  { %v207_v19 = vpop.eup %206 }
 0x17e   :  { %v150_v20 = vadd.f32 1.0, %v207_v19 }
 0x180   :  { %210 = vrcp.f32 %v150_v20 }
 0x181   :  { %v209_v21 = vpop.eup %208 }
 0x182   :  { %v151_v22 = vadd.f32 1.0, %v209_v21 }
 0x184   :  { %212 = vrcp.f32 %v151_v22 }
 0x18a   :  { %v211_v23 = vpop.eup %210 }
 0x18b   :  { %v158_v25 = vmul.f32 %v211_v23, %v109_v6 }
 0x18d   :  { %v160_v26 = vadd.f32 %v158_v25, %v156_v24 }
 0x18e   :  { %v213_v27 = vpop.eup %212 }
 0x18f   :  { %162 = vst [vmem:[%s324_s6] sm:$0xff] %v160_v26  ;;  %v159_v29 = vmul.f32 %v213_v27, %v197_v5 }
 0x191   :  { %v161_v30 = vadd.f32 %v159_v29, %v157_v28 }
 0x193   :  { %163 = vst [vmem:[%s324_s6 + $0x8] sm:$0xff] %v161_v30 }
 0x194   :  { %236 = dma.done.wait [#allocation4], 256  }
 0x195   :  { %237 = vsyncadd [#allocation4], 4294967040 }
 0x196   :  { %183 = vsyncpa [#allocation4], 1 }

// kernel: dagnn_forward.6
= control target key start
LH: loop header
LB: loop body
LE: loop exit
PB: predicated region body
PF: predicated region fallthrough
CT: control target
= control target key end

     0   :  { %s624_s1 = inlined_call_operand.vmem [shape: f32[128,128], index: 1, kind: input, shape index: {}]   ;;  %s625_s0 = inlined_call_operand.vmem [shape: f32[16,128], index: 0, kind: input, shape index: {}]   ;;  %s626_s3 = inlined_call_operand.vmem [shape: f32[128,128], index: 3, kind: input, shape index: {}]   ;;  %s627_s2 = inlined_call_operand.vmem [shape: f32[1,128], index: 2, kind: input, shape index: {}]   ;;  %s628_s4 = inlined_call_operand.vmem [shape: f32[1,128], index: 4, kind: input, shape index: {}]   ;;  %s629_s5 = inlined_call_operand.vmem [shape: f32[1,128], index: 5, kind: input, shape index: {}]   ;;  %s630_s7 = inlined_call_operand.vmem [shape: f32[16,128], index: 7, kind: output, shape index: {0}]   ;;  %s631_s6 = inlined_call_operand.<no memory space> [shape: f32[1], index: 6, kind: input, shape index: {}]   ;;  %s632_s8 = inlined_call_operand.vmem [shape: f32[16,128], index: 8, kind: output, shape index: {1}]  }
   0x1   :  { %v31_v0 = vld [vmem:[%s624_s1] sm:$0xff]  ;;  %v32_v1 = vld [vmem:[%s624_s1 + $0x8] sm:$0xff]  ;;  %v33_v2 = vld [vmem:[%s624_s1 + $0x10] sm:$0xff] }
   0x2   :  { %v381_v3 = vpack.c.bf16 %v32_v1, %v31_v0  ;;  %v34_v4 = vld [vmem:[%s624_s1 + $0x18] sm:$0xff]  ;;  %v35_v6 = vld [vmem:[%s624_s1 + $0x20] sm:$0xff]  ;;  %v36_v7 = vld [vmem:[%s624_s1 + $0x28] sm:$0xff]  ;;  %v245_v1 = vstv %s631_s6 }
   0x3   :  { %v385_v5 = vpack.c.bf16 %v34_v4, %v33_v2  ;;  %v389_v8 = vpack.c.bf16 %v36_v7, %v35_v6  ;;  %v37_v9 = vld [vmem:[%s624_s1 + $0x30] sm:$0xff]  ;;  %v38_v10 = vld [vmem:[%s624_s1 + $0x38] sm:$0xff]  ;;  %v29_v11 = vld [vmem:[%s625_s0] sm:$0xff] }
   0x4   :  { %382 = vmatprep.subr.bf16.mxu0 %v381_v3  ;;  %343 = vmatprep.mubr.f32.mxu0 %v29_v11  ;;  %v131_v12 = vld [vmem:[%s626_s3] sm:$0xff]  ;;  %v132_v13 = vld [vmem:[%s626_s3 + $0x8] sm:$0xff]  ;;  %v133_v14 = vld [vmem:[%s626_s3 + $0x10] sm:$0xff]  ;;  %v393_v20 = vpack.c.bf16 %v38_v10, %v37_v9 }
   0x5   :  { %384 = vmatpush3.bf16.msra.mxu0 %v381_v3  ;;  %v413_v15 = vpack.c.bf16 %v132_v13, %v131_v12  ;;  %v134_v16 = vld [vmem:[%s626_s3 + $0x18] sm:$0xff]  ;;  %v135_v18 = vld [vmem:[%s626_s3 + $0x20] sm:$0xff]  ;;  %v136_v19 = vld [vmem:[%s626_s3 + $0x28] sm:$0xff] }
   0x6   :  { %386 = vmatprep.subr.bf16.mxu0 %v385_v5  ;;  %v417_v17 = vpack.c.bf16 %v134_v16, %v133_v14  ;;  %v39_v21 = vld [vmem:[%s624_s1 + $0x40] sm:$0xff]  ;;  %v40_v22 = vld [vmem:[%s624_s1 + $0x48] sm:$0xff]  ;;  %v421_v23 = vpack.c.bf16 %v136_v19, %v135_v18  ;;  %v137_v24 = vld [vmem:[%s626_s3 + $0x30] sm:$0xff] }
   0x7   :  { %414 = vmatprep.subr.bf16.mxu1 %v413_v15  ;;  %v138_v25 = vld [vmem:[%s626_s3 + $0x38] sm:$0xff]  ;;  %v397_v26 = vpack.c.bf16 %v40_v22, %v39_v21  ;;  %v41_v27 = vld [vmem:[%s624_s1 + $0x50] sm:$0xff]  ;;  %v139_v30 = vld [vmem:[%s626_s3 + $0x40] sm:$0xff] }
   0x8   :  { %416 = vmatpush3.bf16.msra.mxu1 %v413_v15  ;;  %v42_v28 = vld [vmem:[%s624_s1 + $0x58] sm:$0xff]  ;;  %v425_v29 = vpack.c.bf16 %v138_v25, %v137_v24  ;;  %v140_v31 = vld [vmem:[%s626_s3 + $0x48] sm:$0xff]  ;;  %v43_v33 = vld [vmem:[%s624_s1 + $0x60] sm:$0xff] }
   0x9   :  { %388 = vmatpush3.bf16.msra.mxu0 %v385_v5  ;;  %418 = vmatprep.subr.bf16.mxu1 %v417_v17  ;;  %v401_v32 = vpack.c.bf16 %v42_v28, %v41_v27  ;;  %v44_v34 = vld [vmem:[%s624_s1 + $0x68] sm:$0xff]  ;;  %v429_v35 = vpack.c.bf16 %v140_v31, %v139_v30  ;;  %v141_v36 = vld [vmem:[%s626_s3 + $0x50] sm:$0xff]  ;;  %v142_v37 = vld [vmem:[%s626_s3 + $0x58] sm:$0xff] }
   0xa   :  { %390 = vmatprep.subr.bf16.mxu0 %v389_v8  ;;  %v405_v38 = vpack.c.bf16 %v44_v34, %v43_v33  ;;  %v45_v39 = vld [vmem:[%s624_s1 + $0x70] sm:$0xff]  ;;  %v46_v40 = vld [vmem:[%s624_s1 + $0x78] sm:$0xff]  ;;  %v433_v41 = vpack.c.bf16 %v142_v37, %v141_v36  ;;  %v143_v42 = vld [vmem:[%s626_s3 + $0x60] sm:$0xff] }
   0xb   :  { %v144_v43 = vld [vmem:[%s626_s3 + $0x68] sm:$0xff]  ;;  %v409_v44 = vpack.c.bf16 %v46_v40, %v45_v39  ;;  %v145_v47 = vld [vmem:[%s626_s3 + $0x70] sm:$0xff]  ;;  %v146_v48 = vld [vmem:[%s626_s3 + $0x78] sm:$0xff] }
   0xc   :  { %420 = vmatpush3.bf16.msra.mxu1 %v417_v17  ;;  %v437_v45 = vpack.c.bf16 %v144_v43, %v143_v42  ;;  %v30_v46 = vld [vmem:[%s625_s0 + $0x8] sm:$0xff]  ;;  %v441_v49 = vpack.c.bf16 %v146_v48, %v145_v47  ;;  %v272_v50 = vld [vmem:[%s627_s2] ss:$0 sm:$0xff] }
   0xd   :  { %392 = vmatpush3.bf16.msra.mxu0 %v389_v8  ;;  %422 = vmatprep.subr.bf16.mxu1 %v421_v23  ;;  %v273_v57 = vld [vmem:[%s628_s4] ss:$0 sm:$0xff] }
   0xe   :  { %394 = vmatprep.subr.bf16.mxu0 %v393_v20  ;;  %v274_v61 = vld [vmem:[%s629_s5] ss:$0 sm:$0xff] }
  0x10   :  { %424 = vmatpush3.bf16.msra.mxu1 %v421_v23 }
  0x11   :  { %396 = vmatpush3.bf16.msra.mxu0 %v393_v20  ;;  %426 = vmatprep.subr.bf16.mxu1 %v425_v29 }
  0x12   :  { %398 = vmatprep.subr.bf16.mxu0 %v397_v26 }
  0x14   :  { %428 = vmatpush3.bf16.msra.mxu1 %v425_v29 }
  0x15   :  { %400 = vmatpush3.bf16.msra.mxu0 %v397_v26  ;;  %430 = vmatprep.subr.bf16.mxu1 %v429_v35 }
  0x16   :  { %402 = vmatprep.subr.bf16.mxu0 %v401_v32 }
  0x18   :  { %432 = vmatpush3.bf16.msra.mxu1 %v429_v35 }
  0x19   :  { %404 = vmatpush3.bf16.msra.mxu0 %v401_v32  ;;  %434 = vmatprep.subr.bf16.mxu1 %v433_v41 }
  0x1a   :  { %406 = vmatprep.subr.bf16.mxu0 %v405_v38 }
  0x1c   :  { %436 = vmatpush3.bf16.msra.mxu1 %v433_v41 }
  0x1d   :  { %408 = vmatpush3.bf16.msra.mxu0 %v405_v38  ;;  %438 = vmatprep.subr.bf16.mxu1 %v437_v45 }
  0x1e   :  { %410 = vmatprep.subr.bf16.mxu0 %v409_v44 }
  0x20   :  { %440 = vmatpush3.bf16.msra.mxu1 %v437_v45 }
  0x21   :  { %412 = vmatpush3.bf16.msra.mxu0 %v409_v44  ;;  %442 = vmatprep.subr.bf16.mxu1 %v441_v49 }
  0x24   :  { %344 = vmatmul.mubr.f32.vlgmr.msra.gmra.mrb[0].mxu0 %v30_v46  ;;  %444 = vmatpush3.bf16.msra.mxu1 %v441_v49 }
  0xf7   :  { %v345_v51 = vpop.f32.mrb[0].mxu0 }
  0xf8   :  { %v126_v52 = vadd.f32 %v345_v51, %v272_v50  ;;  %v120_v53 = vpop.f32.mrb[1].mxu0 }
  0xf9   :  { %v121_v54 = vadd.f32 %v272_v50, %v120_v53 }
  0xfa   :  { %v130_v56 = vmax.f32 %v126_v52, 0.0 }
  0xfb   :  { %v129_v55 = vmax.f32 %v121_v54, 0.0 }
  0xfd   :  { %378 = vmatprep.mubr.f32.mxu1 %v129_v55 }
  0xfe   :  { %379 = vmatmul.mubr.f32.vlgmr.msra.gmra.mrb[0].mxu1 %v130_v56 }
 0x1d1   :  { %v380_v58 = vpop.f32.mrb[0].mxu1 }
 0x1d2   :  { %v226_v59 = vadd.f32 %v380_v58, %v273_v57  ;;  %v220_v60 = vpop.f32.mrb[1].mxu1 }
 0x1d3   :  { %v221_v62 = vadd.f32 %v273_v57, %v220_v60 }
 0x1d4   :  { %230 = vst [vmem:[%s630_s7 + $0x8] sm:$0xff] %v226_v59  ;;  %v239_v0 = vmul.f32 %v274_v61, %v226_v59 }
 0x1d5   :  { %229 = vst [vmem:[%s630_s7] sm:$0xff] %v221_v62  ;;  %v238_v63 = vmul.f32 %v274_v61, %v221_v62 }
 0x1d7   :  { %240 = vadd.xlane.f32.xlu0 %v238_v63 }
 0x1db   :  { %242 = vadd.xlane.f32.xlu0 %v239_v0 }
 0x264   :  { %v241_v2 = vpop.xlane.xlu0 %240 }
 0x265   :  { %v246_v3 = vadd.f32 %v245_v1, %v241_v2 }
 0x267   :  { %v248_v4 = vsub.f32 0.0, %v246_v3 }
 0x268   :  { %v243_v5 = vpop.xlane.xlu0 %242 }
 0x269   :  { %v250_v6 = vmul.f32 1.442695, %v248_v4  ;;  %v247_v7 = vadd.f32 %v245_v1, %v243_v5 }
 0x26b   :  { %445 = vpow2.f32 %v250_v6  ;;  %v249_v8 = vsub.f32 0.0, %v247_v7 }
 0x26d   :  { %v252_v9 = vmul.f32 1.442695, %v249_v8 }
 0x26f   :  { %447 = vpow2.f32 %v252_v9 }
 0x275   :  { %v446_v10 = vpop.eup %445 }
 0x276   :  { %v254_v11 = vadd.f32 1.0, %v446_v10 }
 0x278   :  { %449 = vrcp.f32 %v254_v11 }
 0x279   :  { %v448_v12 = vpop.eup %447 }
 0x27a   :  { %v255_v13 = vadd.f32 1.0, %v448_v12 }
 0x27c   :  { %451 = vrcp.f32 %v255_v13 }
 0x282   :  { %v450_v14 = vpop.eup %449 }
 0x283   :  { %v260_v15 = vmul.f32 %v450_v14, %v221_v62 }
 0x285   :  { %262 = vst [vmem:[%s632_s8] sm:$0xff] %v260_v15 }
 0x286   :  { %v452_v16 = vpop.eup %451 }
 0x287   :  { %v261_v17 = vmul.f32 %v452_v16, %v226_v59 }
 0x289   :  { %263 = vst [vmem:[%s632_s8 + $0x8] sm:$0xff] %v261_v17 }

// kernel: dagnn_forward.7
= control target key start
LH: loop header
LB: loop body
LE: loop exit
PB: predicated region body
PF: predicated region fallthrough
CT: control target
= control target key end

     0   :  { %vm35_vm0 = vcmask 130048   ;;  %s269_s1 = inlined_call_operand.vmem [shape: f32[16,128], index: 1, kind: input, shape index: {}]   ;;  %s270_s0 = inlined_call_operand.vmem [shape: f32[16,16], index: 0, kind: input, shape index: {}]   ;;  %s271_s2 = inlined_call_operand.vmem [shape: f32[1,128], index: 2, kind: input, shape index: {}]   ;;  %s272_s5 = inlined_call_operand.vmem [shape: f32[16,128], index: 5, kind: output, shape index: {0}]   ;;  %s273_s3 = inlined_call_operand.<no memory space> [shape: f32[1], index: 3, kind: input, shape index: {}]   ;;  %s274_s4 = inlined_call_operand.vmem [shape: f32[16,128], index: 4, kind: input, shape index: {}, may-alias: {4,6}]   ;;  %s275_s6 = inlined_call_operand.vmem [shape: f32[16,128], index: 6, kind: output, shape index: {1}, may-alias: {4,6}]  }
   0x1   :  { %v33_v0 = vld [vmem:[%s269_s1] sm:$0xff]  ;;  %v34_v1 = vld [vmem:[%s269_s1 + $0x8] sm:$0xff]  ;;  %v140_v10 = vstv %s273_s3 }
   0x2   :  { %v31_v2 = vld [vmem:[%s270_s0] sm:$0xff]  ;;  %v185_v3 = vpack.c.bf16 %v34_v1, %v33_v0  ;;  %v32_v4 = vld [vmem:[%s270_s0 + $0x8] sm:$0xff] }
   0x3   :  { %182 = vmatprep.mubr.msk.f32.mxu0 %vm35_vm0, %v31_v2  ;;  %v173_v7 = vld [vmem:[%s271_s2] ss:$0 sm:$0xff]  ;;  %v156_v28 = vld [vmem:[%s274_s4 + $0x8] sm:$0xff] }
   0x4   :  { %186 = vmatprep.subr.bf16.mxu0 %v185_v3  ;;  %v155_v24 = vld [vmem:[%s274_s4] sm:$0xff] }
   0x5   :  { %188 = vmatpush3.bf16.msra.mxu0 %v185_v3 }
   0x8   :  { %183 = vmatmul.mubr.msk.f32.vlgmr.msra.gmra.mrb[0].mxu0 %vm35_vm0, %v32_v4 }
  0xdb   :  { %v184_v5 = vpop.f32.mrb[0].mxu0 }
  0xdc   :  { %v108_v6 = vpop.f32.mrb[1].mxu0  ;;  %120 = vst [vmem:[%s272_s5 + $0x8] sm:$0xff] %v184_v5  ;;  %v134_v9 = vmul.f32 %v184_v5, %v173_v7 }
  0xdd   :  { %119 = vst [vmem:[%s272_s5] sm:$0xff] %v108_v6  ;;  %v133_v8 = vmul.f32 %v173_v7, %v108_v6 }
  0xdf   :  { %135 = vadd.xlane.f32.xlu0 %v133_v8 }
  0xe3   :  { %137 = vadd.xlane.f32.xlu0 %v134_v9 }
 0x16c   :  { %v136_v11 = vpop.xlane.xlu0 %135 }
 0x16d   :  { %v141_v12 = vadd.f32 %v140_v10, %v136_v11 }
 0x16f   :  { %v143_v13 = vsub.f32 0.0, %v141_v12 }
 0x170   :  { %v138_v14 = vpop.xlane.xlu0 %137 }
 0x171   :  { %v145_v15 = vmul.f32 1.442695, %v143_v13  ;;  %v142_v16 = vadd.f32 %v140_v10, %v138_v14 }
 0x173   :  { %190 = vpow2.f32 %v145_v15  ;;  %v144_v17 = vsub.f32 0.0, %v142_v16 }
 0x175   :  { %v147_v18 = vmul.f32 1.442695, %v144_v17 }
 0x177   :  { %192 = vpow2.f32 %v147_v18 }
 0x17d   :  { %v191_v19 = vpop.eup %190 }
 0x17e   :  { %v149_v20 = vadd.f32 1.0, %v191_v19 }
 0x180   :  { %194 = vrcp.f32 %v149_v20 }
 0x181   :  { %v193_v21 = vpop.eup %192 }
 0x182   :  { %v150_v22 = vadd.f32 1.0, %v193_v21 }
 0x184   :  { %196 = vrcp.f32 %v150_v22 }
 0x18a   :  { %v195_v23 = vpop.eup %194 }
 0x18b   :  { %v157_v25 = vmul.f32 %v195_v23, %v108_v6 }
 0x18d   :  { %v159_v26 = vadd.f32 %v157_v25, %v155_v24 }
 0x18e   :  { %v197_v27 = vpop.eup %196 }
 0x18f   :  { %161 = vst [vmem:[%s275_s6] sm:$0xff] %v159_v26  ;;  %v158_v29 = vmul.f32 %v197_v27, %v184_v5 }
 0x191   :  { %v160_v30 = vadd.f32 %v158_v29, %v156_v28 }
 0x193   :  { %162 = vst [vmem:[%s275_s6 + $0x8] sm:$0xff] %v160_v30 }

</bundles_post_ra>
